<compile_context>
chip_gen: v7x
topology: tpu7x:2x2x1
jax: 0.10.0
libtpu: 0.0.40
codegen_flags: <defaults>
</compile_context>

<pallas_src>
import functools

import jax
import jax.numpy as jnp
from jax import lax
from jax.experimental import pallas as pl
from jax.experimental.pallas import tpu as pltpu

_MIB = 1024 * 1024


def _hw_defaults():
    """(vmem_limit_bytes, tile_vmem_budget_bytes, default_num_shards)."""
    kind = ""
    try:
        kind = jax.devices()[0].device_kind.lower()
    except Exception:
        pass
    if "v7" in kind:
        # 64 MiB physical VMEM, 2 TensorCores per chip.
        return 40 * _MIB, 20 * _MIB, 2
    if any(g in kind for g in ("v4", "v5", "v6")):
        # 128 MiB physical VMEM, single TensorCore.
        return 96 * _MIB, 48 * _MIB, 1
    # Unknown part: conservative settings that are known to compile.
    return 48 * _MIB, 24 * _MIB, 1


def _alpha_loss_kernel(p_ref, pi_ref, out_ref, acc_ref, *,
                       total_rows, block_rows, tiles_per_shard):
    """One (shard, tile) grid step.

    p_ref, pi_ref : (block_rows, cols)  lane-dense tile of probas / self-play probas
    out_ref       : (1, 1)              SMEM per-shard partial policy-CE sum
    acc_ref       : (block_rows, cols)  VMEM f32 elementwise accumulator (scratch)
    """
    s = pl.program_id(0)          # shard axis ("parallel"; 2 TCs on v7x)
    t = pl.program_id(1)          # tile reduction axis ("arbitrary")
    tile_idx = s * tiles_per_shard + t
    row0 = tile_idx * block_rows

    @pl.when(t == 0)
    def _():
        acc_ref[...] = jnp.zeros_like(acc_ref)

    def tile_ce():
        # Upcast in-kernel: bf16 inputs halve HBM traffic, log stays in f32
        # (mandatory on v5e: no bf16 EUP).
        p = p_ref[...].astype(jnp.float32)
        pi = pi_ref[...].astype(jnp.float32)
        return -pi * jnp.log(jnp.float32(1e-6) + p)

    fully_in = row0 + block_rows <= total_rows
    valid = row0 < total_rows     # clamped duplicate tiles (shard split) are skipped

    # Common case: tile fully in bounds -> no mask work at all, pure VPU/EUP adds.
    @pl.when(fully_in)
    def _():
        acc_ref[...] += tile_ce()

    # Only the single straddling tile pays for the iota + compare + select.
    @pl.when(jnp.logical_and(valid, jnp.logical_not(fully_in)))
    def _():
        rows_idx = row0 + lax.broadcasted_iota(jnp.int32, (block_rows, 1), 0)
        # Select (not multiply) so NaN/Inf from garbage rows is discarded safely.
        acc_ref[...] += jnp.where(rows_idx < total_rows, tile_ce(),
                                  jnp.float32(0.0))

    # One cross-lane reduce per shard, at the very end.
    @pl.when(t == pl.num_programs(1) - 1)
    def _():
        out_ref[0, 0] = jnp.sum(acc_ref[...])


def alpha_loss(winner, self_play_winner, probas, self_play_probas, *,
               weight=1.0, block_rows=None, num_shards=None):
    """Pallas implementation of AlphaLoss.forward.

    winner, self_play_winner : (B, 1) or (B,)   any float dtype
    probas, self_play_probas : (B, A)           f32 or bf16 (upcast in-kernel)
    returns scalar float32
    """
    batch, actions = probas.shape
    assert self_play_probas.shape == (batch, actions)

    vmem_limit, tile_budget, default_shards = _hw_defaults()

    # ------------------------------------------------------------------ layout
    # The policy CE reduces over both batch and action axes, so we are free to
    # present the data in any lane-dense 2-D shape (row-major reshape is free).
    n_elems = batch * actions
    if n_elems % 128 == 0:
        cols = 128
        while cols * 2 <= 1024 and n_elems % (cols * 2) == 0:
            cols *= 2
        rows = n_elems // cols
        p2d = probas.reshape(rows, cols)
        pi2d = self_play_probas.reshape(rows, cols)
    else:
        # Fallback: original layout (cols == full A is always a legal block dim).
        rows, cols = batch, actions
        p2d, pi2d = probas, self_play_probas

    # ------------------------------------------------------------------ tiling
    itemsize = max(jnp.dtype(p2d.dtype).itemsize, jnp.dtype(pi2d.dtype).itemsize)
    # 2 inputs x 2 pipeline buffers + f32 accumulator, per row of the tile.
    bytes_per_row = cols * (2 * 2 * itemsize + 4)
    if block_rows is None:
        max_rows = max(8, tile_budget // bytes_per_row)
        block_rows = rows if rows <= max_rows else max(8, (max_rows // 8) * 8)
    block_rows = int(min(block_rows, rows))
    if block_rows < rows and block_rows % 8 != 0:
        block_rows = max(8, (block_rows // 8) * 8)   # (8, 128) sublane constraint

    num_tiles = -(-rows // block_rows)
    if num_shards is None:
        num_shards = default_shards
    num_shards = max(1, min(int(num_shards), num_tiles))
    tiles_per_shard = -(-num_tiles // num_shards)

    def tile_map(s, t):
        # Clamp trailing (out-of-range) tiles of a shard to the last valid tile;
        # the kernel skips their compute entirely.
        return (jnp.minimum(s * tiles_per_shard + t, num_tiles - 1), 0)

    kernel = functools.partial(
        _alpha_loss_kernel,
        total_rows=rows, block_rows=block_rows, tiles_per_shard=tiles_per_shard)

    partials = pl.pallas_call(
        kernel,
        out_shape=jax.ShapeDtypeStruct((num_shards, 1), jnp.float32),
        grid_spec=pltpu.PrefetchScalarGridSpec(
            num_scalar_prefetch=0,
            grid=(num_shards, tiles_per_shard),
            in_specs=[
                pl.BlockSpec((block_rows, cols), tile_map),   # probas
                pl.BlockSpec((block_rows, cols), tile_map),   # self_play_probas
            ],
            out_specs=pl.BlockSpec((1, 1), lambda s, t: (s, 0),
                                   memory_space=pltpu.MemorySpace.SMEM),
            scratch_shapes=[pltpu.VMEM((block_rows, cols), jnp.float32)],
        ),
        compiler_params=pltpu.CompilerParams(
            dimension_semantics=("parallel", "arbitrary"),
            vmem_limit_bytes=vmem_limit,
        ),
    )(p2d, pi2d)

    # Value error is O(B): a trivial XLA fusion in the wrapper (keeps the two
    # winner tensors out of the kernel's VMEM / DMA budget entirely).
    w = winner.reshape(-1).astype(jnp.float32)
    z = self_play_winner.reshape(-1).astype(jnp.float32)
    value_sum = jnp.sum((z - w) ** 2)
    policy_sum = jnp.sum(partials)

    # Batch mean + loss weight folded into one scalar multiply.
    return (value_sum + policy_sum) * jnp.float32(float(weight) / batch)


def alpha_loss_ref(winner, self_play_winner, probas, self_play_probas, *, weight=1.0):
    """Pure-JAX reference matching the PyTorch module."""
    winner = winner.reshape(-1).astype(jnp.float32)
    self_play_winner = self_play_winner.reshape(-1).astype(jnp.float32)
    probas = probas.astype(jnp.float32)
    self_play_probas = self_play_probas.astype(jnp.float32)
    value_error = (self_play_winner - winner) ** 2
    policy_error = jnp.sum(-self_play_probas * jnp.log(1e-6 + probas), axis=1)
    total_error = jnp.mean(value_error + policy_error)
    return total_error * weight


def _make_inputs(key, B, A, probas_dtype=jnp.float32):
    k1, k2, k3, k4 = jax.random.split(key, 4)
    winner = jax.random.uniform(k1, (B, 1), jnp.float32, -1.0, 1.0)
    self_play_winner = jax.random.uniform(k2, (B, 1), jnp.float32, -1.0, 1.0)
    probas = jax.nn.softmax(jax.random.normal(k3, (B, A), jnp.float32), axis=-1)
    self_play_probas = jax.nn.softmax(jax.random.normal(k4, (B, A), jnp.float32), axis=-1)
    return (winner, self_play_winner,
            probas.astype(probas_dtype), self_play_probas.astype(probas_dtype))


if __name__ == "__main__":
    key = jax.random.PRNGKey(0)
    k1, k2, k3, k4 = jax.random.split(key, 4)

    # Case 1: small, single tile, flattened lane-dense layout (256 % 128 == 0).
    w1, z1, p1, pi1 = _make_inputs(k1, B=8, A=32)
    out1 = jax.block_until_ready(alpha_loss(w1, z1, p1, pi1, weight=0.5))
    ref1 = alpha_loss_ref(w1, z1, p1, pi1, weight=0.5)
    assert jnp.allclose(out1, ref1, rtol=1e-5, atol=1e-5), (out1, ref1)

    # Case 2: A=160 (not a multiple of 128) -> flattened to (375, 128); multi-tile
    # with a ragged last tile and a 2-shard split with a clamped duplicate tile.
    w2, z2, p2, pi2 = _make_inputs(k2, B=300, A=160)
    out2 = jax.block_until_ready(
        alpha_loss(w2, z2, p2, pi2, weight=1.7, block_rows=128, num_shards=2))
    ref2 = alpha_loss_ref(w2, z2, p2, pi2, weight=1.7)
    assert jnp.allclose(out2, ref2, rtol=1e-5, atol=1e-5), (out2, ref2)

    # Case 3: bf16 probability inputs (half the HBM bytes), upcast in-kernel.
    w3, z3, p3, pi3 = _make_inputs(k3, B=300, A=160, probas_dtype=jnp.bfloat16)
    out3 = jax.block_until_ready(
        alpha_loss(w3, z3, p3, pi3, weight=1.0, block_rows=128, num_shards=2))
    ref3 = alpha_loss_ref(w3, z3, p3.astype(jnp.float32), pi3.astype(jnp.float32),
                          weight=1.0)
    assert jnp.allclose(out3, ref3, rtol=1e-5, atol=1e-5), (out3, ref3)

    # Case 4: B*A not a multiple of 128 -> fallback (B, A) layout, single tile.
    w4, z4, p4, pi4 = _make_inputs(k4, B=7, A=33)
    out4 = jax.block_until_ready(alpha_loss(w4, z4, p4, pi4, weight=2.0))
    ref4 = alpha_loss_ref(w4, z4, p4, pi4, weight=2.0)
    assert jnp.allclose(out4, ref4, rtol=1e-5, atol=1e-5), (out4, ref4)

    print("KERNEL_OK")
</pallas_src>

<mosaic_0001>
module attributes {stable_mosaic.version = 11 : i64} {
  func.func @_alpha_loss_kernel(%arg0: i32, %arg1: i32, %arg2: memref<1x256xf32, #tpu.memory_space<vmem>>, %arg3: memref<1x256xf32, #tpu.memory_space<vmem>>, %arg4: memref<1x1xf32, #tpu.memory_space<smem>>, %arg5: memref<1x256xf32, #tpu.memory_space<vmem>>) attributes {dimension_semantics = [#tpu.dimension_semantics<parallel>, #tpu.dimension_semantics<arbitrary>], iteration_bounds = array<i64: 1, 1>, scalar_prefetch = 0 : i64, scratch_operands = 1 : i64, tpu.core_type = #tpu.core_type<tc>, window_params = [{transform_indices = @transform_0, window_bounds = array<i64: 1, 256>}, {transform_indices = @transform_1, window_bounds = array<i64: 1, 256>}, {transform_indices = @transform_2, window_bounds = array<i64: 1, 1>}]} {
    %c1_i32 = arith.constant 1 : i32
    %0 = arith.muli %arg0, %c1_i32 : i32
    %1 = arith.addi %0, %arg1 : i32
    %c1_i32_0 = arith.constant 1 : i32
    %2 = arith.muli %1, %c1_i32_0 : i32
    %c0_i32 = arith.constant 0 : i32
    %3 = arith.cmpi eq, %arg1, %c0_i32 : i32
    %4 = arith.extui %3 : i1 to i32
    %c0_i32_1 = arith.constant 0 : i32
    %5 = arith.cmpi ne, %4, %c0_i32_1 : i32
    scf.if %5 {
      %cst = arith.constant 0.000000e+00 : f32
      %18 = vector.broadcast %cst : f32 to vector<1x256xf32>
      %c0 = arith.constant 0 : index
      %c0_9 = arith.constant 0 : index
      %19 = vector.load %arg5[%c0, %c0_9] : memref<1x256xf32, #tpu.memory_space<vmem>>, vector<1x256xf32>
      tpu.vector_store %arg5[%c0, %c0_9], %18 {strides = array<i32>} : memref<1x256xf32, #tpu.memory_space<vmem>>, vector<1x256xf32>,
    } else {
    }
    %c1_i32_2 = arith.constant 1 : i32
    %6 = arith.addi %2, %c1_i32_2 : i32
    %c1_i32_3 = arith.constant 1 : i32
    %7 = arith.cmpi sle, %6, %c1_i32_3 : i32
    %c1_i32_4 = arith.constant 1 : i32
    %8 = arith.cmpi slt, %2, %c1_i32_4 : i32
    %9 = arith.extui %7 : i1 to i32
    %c0_i32_5 = arith.constant 0 : i32
    %10 = arith.cmpi ne, %9, %c0_i32_5 : i32
    scf.if %10 {
      %c0 = arith.constant 0 : index
      %c0_9 = arith.constant 0 : index
      %18 = vector.load %arg5[%c0, %c0_9] : memref<1x256xf32, #tpu.memory_space<vmem>>, vector<1x256xf32>
      %c0_10 = arith.constant 0 : index
      %c0_11 = arith.constant 0 : index
      %19 = vector.load %arg2[%c0_10, %c0_11] : memref<1x256xf32, #tpu.memory_space<vmem>>, vector<1x256xf32>
      %c0_12 = arith.constant 0 : index
      %c0_13 = arith.constant 0 : index
      %20 = vector.load %arg3[%c0_12, %c0_13] : memref<1x256xf32, #tpu.memory_space<vmem>>, vector<1x256xf32>
      %cst = arith.constant 0.000000e+00 : f32
      %21 = vector.broadcast %cst : f32 to vector<1x256xf32>
      %22 = arith.subf %21, %20 : vector<1x256xf32>
      %cst_14 = arith.constant 9.99999997E-7 : f32
      %23 = vector.broadcast %cst_14 : f32 to vector<1x256xf32>
      %24 = arith.addf %23, %19 : vector<1x256xf32>
      %25 = math.log %24 : vector<1x256xf32>
      %26 = arith.mulf %22, %25 : vector<1x256xf32>
      %27 = arith.addf %18, %26 : vector<1x256xf32>
      %c0_15 = arith.constant 0 : index
      %c0_16 = arith.constant 0 : index
      %28 = vector.load %arg5[%c0_15, %c0_16] : memref<1x256xf32, #tpu.memory_space<vmem>>, vector<1x256xf32>
      tpu.vector_store %arg5[%c0_15, %c0_16], %27 {strides = array<i32>} : memref<1x256xf32, #tpu.memory_space<vmem>>, vector<1x256xf32>,
    } else {
    }
    %true = arith.constant true
    %11 = arith.xori %7, %true : i1
    %12 = arith.andi %8, %11 : i1
    %13 = arith.extui %12 : i1 to i32
    %c0_i32_6 = arith.constant 0 : i32
    %14 = arith.cmpi ne, %13, %c0_i32_6 : i32
    scf.if %14 {
      %18 = tpu.iota {dimensions = array<i32: 0>} : vector<1x1xi32>
      %19 = vector.broadcast %2 : i32 to vector<1x1xi32>
      %20 = arith.addi %19, %18 : vector<1x1xi32>
      %c0 = arith.constant 0 : index
      %c0_9 = arith.constant 0 : index
      %21 = vector.load %arg5[%c0, %c0_9] : memref<1x256xf32, #tpu.memory_space<vmem>>, vector<1x256xf32>
      %c1_i32_10 = arith.constant 1 : i32
      %22 = vector.broadcast %c1_i32_10 : i32 to vector<1x1xi32>
      %23 = arith.cmpi slt, %20, %22 : vector<1x1xi32>
      %c0_11 = arith.constant 0 : index
      %c0_12 = arith.constant 0 : index
      %24 = vector.load %arg2[%c0_11, %c0_12] : memref<1x256xf32, #tpu.memory_space<vmem>>, vector<1x256xf32>
      %c0_13 = arith.constant 0 : index
      %c0_14 = arith.constant 0 : index
      %25 = vector.load %arg3[%c0_13, %c0_14] : memref<1x256xf32, #tpu.memory_space<vmem>>, vector<1x256xf32>
      %cst = arith.constant 0.000000e+00 : f32
      %26 = vector.broadcast %cst : f32 to vector<1x256xf32>
      %27 = arith.subf %26, %25 : vector<1x256xf32>
      %cst_15 = arith.constant 9.99999997E-7 : f32
      %28 = vector.broadcast %cst_15 : f32 to vector<1x256xf32>
      %29 = arith.addf %28, %24 : vector<1x256xf32>
      %30 = math.log %29 : vector<1x256xf32>
      %31 = arith.mulf %27, %30 : vector<1x256xf32>
      %cst_16 = arith.constant 0.000000e+00 : f32
      %32 = vector.shape_cast %23 : vector<1x1xi1> to vector<1x1xi1>
      %33 = vector.broadcast %32 : vector<1x1xi1> to vector<1x256xi1>
      %34 = vector.broadcast %cst_16 : f32 to vector<1x256xf32>
      %35 = arith.select %33, %31, %34 : vector<1x256xi1>, vector<1x256xf32>
      %36 = arith.addf %21, %35 : vector<1x256xf32>
      %c0_17 = arith.constant 0 : index
      %c0_18 = arith.constant 0 : index
      %37 = vector.load %arg5[%c0_17, %c0_18] : memref<1x256xf32, #tpu.memory_space<vmem>>, vector<1x256xf32>
      tpu.vector_store %arg5[%c0_17, %c0_18], %36 {strides = array<i32>} : memref<1x256xf32, #tpu.memory_space<vmem>>, vector<1x256xf32>,
    } else {
    }
    %c0_i32_7 = arith.constant 0 : i32
    %15 = arith.cmpi eq, %arg1, %c0_i32_7 : i32
    %16 = arith.extui %15 : i1 to i32
    %c0_i32_8 = arith.constant 0 : i32
    %17 = arith.cmpi ne, %16, %c0_i32_8 : i32
    scf.if %17 {
      %c0 = arith.constant 0 : index
      %c0_9 = arith.constant 0 : index
      %18 = vector.load %arg5[%c0, %c0_9] : memref<1x256xf32, #tpu.memory_space<vmem>>, vector<1x256xf32>
      %19 = vector.shape_cast %18 : vector<1x256xf32> to vector<1x1x256xf32>
      %cst = arith.constant dense<0.000000e+00> : vector<1xf32>
      %20 = vector.multi_reduction <add>, %19, %cst [1, 2] : vector<1x1x256xf32> to vector<1xf32>
      %21 = vector.shape_cast %20 : vector<1xf32> to vector<1x1x1xf32>
      %22 = vector.extract %21[0, 0, 0] : f32 from vector<1x1x1xf32>
      %c0_10 = arith.constant 0 : index
      %c0_11 = arith.constant 0 : index
      %23 = memref.load %arg4[%c0_10, %c0_11] : memref<1x1xf32, #tpu.memory_space<smem>>
      memref.store %22, %arg4[%c0_10, %c0_11] : memref<1x1xf32, #tpu.memory_space<smem>>
    } else {
    }
    return
  }
  func.func @transform_0(%arg0: i32, %arg1: i32) -> (i32, i32) {
    %c1_i32 = arith.constant 1 : i32
    %0 = arith.muli %arg0, %c1_i32 : i32
    %1 = arith.addi %0, %arg1 : i32
    %c0_i32 = arith.constant 0 : i32
    %2 = arith.minsi %1, %c0_i32 : i32
    %c0_i32_0 = arith.constant 0 : i32
    %c0_i32_1 = arith.constant 0 : i32
    return %2, %c0_i32_0 : i32, i32
  }
  func.func @transform_1(%arg0: i32, %arg1: i32) -> (i32, i32) {
    %c1_i32 = arith.constant 1 : i32
    %0 = arith.muli %arg0, %c1_i32 : i32
    %1 = arith.addi %0, %arg1 : i32
    %c0_i32 = arith.constant 0 : i32
    %2 = arith.minsi %1, %c0_i32 : i32
    %c0_i32_0 = arith.constant 0 : i32
    %c0_i32_1 = arith.constant 0 : i32
    return %2, %c0_i32_0 : i32, i32
  }
  func.func @transform_2(%arg0: i32, %arg1: i32) -> (i32, i32) {
    %c0_i32 = arith.constant 0 : i32
    %c0_i32_0 = arith.constant 0 : i32
    return %arg0, %c0_i32 : i32, i32
  }
}

</mosaic_0001>

<bundles_post_ra>
// kernel: tpu_custom_call.1
= control target key start
LH: loop header
LB: loop body
LE: loop exit
PB: predicated region body
PF: predicated region fallthrough
CT: control target
= control target key end

     0   :  { %7 = vsyncpa [#allocation4], 0  ;;  %s287_s0 = inlined_call_operand.hbm [shape: f32[1,256], index: 0, kind: input, shape index: {}]   ;;  %s288_s1 = inlined_call_operand.vmem [shape: f32[1,256], index: 1, kind: input, shape index: {}]   ;;  %s289_s2 = inlined_call_operand.hbm [shape: f32[1,1], index: 2, kind: output, shape index: {}]  }
   0x1   :  { %8 = vsyncpa [#allocation5], 0  ;;  %s242_s9 = smov [#allocation3]   ;;  %s206_s13 = scalar_lea.hbm %s287_s0, 32 }
   0x2   :  { %s21_s10 = sshll.u32 %s242_s9, 4  ;;  %p207_p0 = scmp.ne.s32.totalorder %s287_s0, %s206_s13  ;;  %s22_s10 = int_to_ptr.vmem [resolvable:$true] %s21_s10 }
   0x3   :  { %p210_p1 = scmp.lt.u32.totalorder %s206_s13, %s287_s0 }
   0x5   :  { %p212_p2 = pnand %p210_p1, %p207_p0 }
   0x7   :  { %215 = shalt.err (!%p212_p2)
}
   0x8   :  { %s216_s18 = scalar_lea.vmem %s22_s10, 32  ;;  %p221_p4 = scmp.lt.s32.totalorder %s22_s10, %s22_s10 }
   0x9   :  { %p217_p3 = scmp.ne.s32.totalorder %s22_s10, %s216_s18  ;;  %p222_p5 = scmp.lt.s32.totalorder %s216_s18, %s216_s18 }
   0xb   :  { %p223_p6 = por %p222_p5, %p221_p4 }
   0xd   :  { %p224_p7 = pnand %p223_p6, %p217_p3 }
   0xf   :  { %227 = shalt.err (!%p224_p7)
}
  0x10   :  { %24 = dma.hbm_to_vmem [thread:$0]  %s287_s0, 32, %s22_s10, [#allocation4]  }
  0x11   :  { %238 = dma.done.wait [#allocation4], 32  }
  0x12   :  { %239 = vsyncadd [#allocation4], 4294967264  ;;  %v65_v0 = vlaneseq  ;;  %v243_v1 = vmov 0.0   ;;  %v77_v2 = vld [vmem:[#allocation3] sm:$0x3]  ;;  %vm162_vm1 = vcmask 1040384  }
  0x13   :  { %v80_v3 = vadd.f32 1e-06, %v77_v2  ;;  %v78_v4 = vld [vmem:[%s288_s1] sm:$0x3]  ;;  %s228_s24 = scalar_lea.hbm %s289_s2, 16 }
  0x14   :  { %vm67_vm0 = vcmp.lt.s32.totalorder %v65_v0, 256  ;;  %v79_v5 = vsub.f32 0.0, %v78_v4  ;;  %v153_v11 = vshrl.u32 %v65_v0, 7  ;;  %p229_p8 = scmp.ne.s32.totalorder %s289_s2, %s228_s24  ;;  %p232_p9 = scmp.lt.u32.totalorder %s228_s24, %s289_s2 }
  0x15   :  { %69 = vst.msk [vmem:[#allocation2] sm:$0x3] %vm67_vm0, %v243_v1  ;;  %204 = vlog2.f32 %v80_v3 }
  0x16   :  { %v154_v12 = vsub.s32 0, %v153_v11  ;;  %v158_v13 = vsub.s32 1, %v153_v11  ;;  %p234_p10 = pnand %p232_p9, %p229_p8 }
  0x1c   :  { %v76_v8 = vld [vmem:[#allocation2] sm:$0x3] }
  0x1f   :  { %v205_v6 = vpop.eup %204 }
  0x20   :  { %v82_v7 = vmul.f32 0.6931472, %v205_v6 }
  0x22   :  { %v83_v9 = vmul.f32 %v82_v7, %v79_v5 }
  0x24   :  { %v84_v10 = vadd.f32 %v83_v9, %v76_v8 }
  0x26   :  { %89 = vst.msk [vmem:[#allocation2] sm:$0x3] %vm67_vm0, %v84_v10 }
  0x2d   :  { %v150_v14 = vld [vmem:[#allocation2] sm:$0x3] }
  0x2e   :  { %v155_v15 = vrot.slane %v150_v14, %v154_v12  ;;  %v159_v16 = vrot.slane %v150_v14, %v158_v13 }
  0x30   :  { %v163_v17 = vsel %vm162_vm1, %v155_v15, 0.0  ;;  %v164_v18 = vsel %vm162_vm1, %v159_v16, 0.0 }
  0x31   :  { %v165_v19 = vadd.f32 %v164_v18, %v163_v17 }
  0x33   :  { %166 = vadd.xlane.f32.xlu0 %v165_v19 }
  0xc0   :  { %v167_v20 = vpop.xlane.xlu0 %166 }
  0xc1   :  { %v168_v21 = vrot.slane %v167_v20, 4 }
  0xc3   :  { %v169_v22 = vadd.f32 %v168_v21, %v167_v20 }
  0xc5   :  { %v170_v23 = vrot.slane %v169_v22, 2 }
  0xc7   :  { %v171_v24 = vadd.f32 %v170_v23, %v169_v22 }
  0xc9   :  { %v172_v25 = vrot.slane %v171_v24, 1 }
  0xcb   :  { %v173_v26 = vadd.f32 %v172_v25, %v171_v24 }
  0xcd   :  { %199 = vpush %v173_v26 }
  0xfe   :  { %s200_s0 = spop %199 }
  0xff   :  { %176 = sst [smem:[#allocation6]] %s200_s0 }
 0x100   :  { %237 = shalt.err (!%p234_p10)
}
 0x101   :  { %s244_s29 = smov [#allocation6]  }
 0x102   :  { %184 = dma.smem_to_hbm %s244_s29, 16, %s289_s2, [#allocation5]  }
 0x103   :  { %240 = dma.done.wait [#allocation5], 16  }
 0x104   :  { %241 = vsyncadd [#allocation5], 4294967280 }
 0x105   :  { %188 = sfence }
 0x106   :  { %189 = vsyncpa [#allocation4], 1 }
 0x107   :  { %190 = vsyncpa [#allocation5], 1 }

</bundles_post_ra>
